<compile_context>
chip_gen: v7x
topology: tpu7x:2x2x1
jax: 0.10.0
libtpu: 0.0.40
codegen_flags: <defaults>
</compile_context>

<pallas_src>
import jax
import jax.numpy as jnp
from jax.experimental import pallas as pl
from jax.experimental.pallas import tpu as pltpu


def _fused_head_kernel(x_ref, w_ref, b_ref, out_ref):
    """x_ref: [tb, H] bf16 CLS activations; w_ref: [H, Np] bf16 fused weights;
    b_ref: [1, Np] f32 fused bias; out_ref: [tb, Np] f32 sigmoid probs."""
    # Single MXU matmul covering both heads, f32 accumulation.
    logits = jnp.dot(x_ref[...], w_ref[...],
                     preferred_element_type=jnp.float32)
    logits = logits + b_ref[...]            # [1, Np] broadcasts over rows
    # Sigmoid (EUP) in f32; single lane-dense, unmasked store.
    out_ref[...] = jax.nn.sigmoid(logits)


def hierarchical_classifier_head(last_hidden_state, wc, bc, wf, bf,
                                 *, max_tile_b=512):
    """last_hidden_state: [B, S, H]; wc: [H, Nc]; bc: [1, Nc];
    wf: [H, Nf]; bf: [1, Nf].  Returns (coarse_probs [B,Nc], fine_probs [B,Nf])."""
    B, S, H = last_hidden_state.shape
    Nc = wc.shape[1]
    Nf = wf.shape[1]
    N = Nc + Nf
    N_pad = pl.cdiv(N, 128) * 128           # lane-dense output width

    # ---- wrapper-side layout plumbing (no heavy compute) -------------------
    # CLS-only pooling: never ship the full [B, S, H] tensor into the kernel.
    pooled = last_hidden_state[:, 0, :].astype(jnp.bfloat16)        # [B, H]

    # Fuse the two heads into one lane-padded weight / bias.
    w_cat = jnp.concatenate([wc, wf], axis=1)                       # [H, N]
    w_cat = jnp.pad(w_cat, ((0, 0), (0, N_pad - N))).astype(jnp.bfloat16)
    b_cat = jnp.concatenate([bc, bf], axis=1)                       # [1, N]
    b_cat = jnp.pad(b_cat, ((0, 0), (0, N_pad - N))).astype(jnp.float32)

    # Sublane-aligned batch tile; pad batch so the grid divides evenly.
    tb = min(max_tile_b, pl.cdiv(B, 8) * 8)
    B_pad = pl.cdiv(B, tb) * tb
    if B_pad != B:
        pooled = jnp.pad(pooled, ((0, B_pad - B), (0, 0)))

    n_tiles = B_pad // tb
    cost = pl.CostEstimate(
        flops=2 * B_pad * H * N_pad,
        transcendentals=B_pad * N_pad,
        bytes_accessed=(B_pad * H * 2 + H * N_pad * 2
                        + N_pad * 4 + B_pad * N_pad * 4),
    )

    out = pl.pallas_call(
        _fused_head_kernel,
        out_shape=jax.ShapeDtypeStruct((B_pad, N_pad), jnp.float32),
        grid=(n_tiles,),
        in_specs=[
            pl.BlockSpec((tb, H), lambda i: (i, 0)),       # CLS activations
            pl.BlockSpec((H, N_pad), lambda i: (0, 0)),    # fused weights
            pl.BlockSpec((1, N_pad), lambda i: (0, 0)),    # fused bias
        ],
        out_specs=pl.BlockSpec((tb, N_pad), lambda i: (i, 0)),
        compiler_params=pltpu.CompilerParams(
            dimension_semantics=("parallel",)),            # 2 TCs on v7x
        cost_estimate=cost,
    )(pooled, w_cat, b_cat)

    # Trim lane/batch padding and split back into the two heads.
    coarse_probs = out[:B, :Nc]
    fine_probs = out[:B, Nc:N]
    return coarse_probs, fine_probs


def init_params(key, hidden_size, num_coarse_labels=4, num_fine_labels=14):
    """Deterministic synthetic init matching nn.Linear(hidden, n) shapes."""
    k1, k2, k3, k4 = jax.random.split(key, 4)
    scale = 1.0 / jnp.sqrt(hidden_size)
    wc = jax.random.uniform(k1, (hidden_size, num_coarse_labels),
                            minval=-scale, maxval=scale, dtype=jnp.float32)
    bc = jax.random.uniform(k2, (1, num_coarse_labels),
                            minval=-scale, maxval=scale, dtype=jnp.float32)
    wf = jax.random.uniform(k3, (hidden_size, num_fine_labels),
                            minval=-scale, maxval=scale, dtype=jnp.float32)
    bf = jax.random.uniform(k4, (1, num_fine_labels),
                            minval=-scale, maxval=scale, dtype=jnp.float32)
    return wc, bc, wf, bf


if __name__ == "__main__":
    # Small shapes consistent with the forward pass.
    B, S, H = 2, 8, 32
    NUM_COARSE, NUM_FINE = 4, 14

    key = jax.random.PRNGKey(0)
    k_hidden, k_params = jax.random.split(key)

    # Synthetic "bert(...).last_hidden_state"  [B, S, H]
    last_hidden_state = jax.random.normal(k_hidden, (B, S, H), dtype=jnp.float32)

    wc, bc, wf, bf = init_params(k_params, H, NUM_COARSE, NUM_FINE)

    coarse_probs, fine_probs = hierarchical_classifier_head(
        last_hidden_state, wc, bc, wf, bf)
    jax.block_until_ready((coarse_probs, fine_probs))

    assert coarse_probs.shape == (B, NUM_COARSE)
    assert fine_probs.shape == (B, NUM_FINE)

    # Reference 1: same bf16-operand / f32-accumulation math as the kernel.
    pooled_bf16 = last_hidden_state[:, 0, :].astype(jnp.bfloat16)
    w_cat = jnp.concatenate([wc, wf], axis=1).astype(jnp.bfloat16)
    b_cat = jnp.concatenate([bc, bf], axis=1).astype(jnp.float32)
    ref_bf16 = jax.nn.sigmoid(
        jnp.dot(pooled_bf16, w_cat, preferred_element_type=jnp.float32) + b_cat)
    assert jnp.allclose(coarse_probs, ref_bf16[:, :NUM_COARSE], atol=1e-5)
    assert jnp.allclose(fine_probs, ref_bf16[:, NUM_COARSE:], atol=1e-5)

    # Reference 2: pure-f32 PyTorch semantics (bf16 operands => loose tol).
    pooled_f32 = last_hidden_state[:, 0, :]
    ref_coarse = jax.nn.sigmoid(pooled_f32 @ wc + bc)
    ref_fine = jax.nn.sigmoid(pooled_f32 @ wf + bf)
    assert jnp.allclose(coarse_probs, ref_coarse, atol=2e-2)
    assert jnp.allclose(fine_probs, ref_fine, atol=2e-2)

    print("KERNEL_OK")
</pallas_src>

<mosaic_0001>
module attributes {stable_mosaic.version = 11 : i64} {
  func.func @_fused_head_kernel(%arg0: i32, %arg1: memref<8x32xbf16, #tpu.memory_space<vmem>>, %arg2: memref<32x128xbf16, #tpu.memory_space<vmem>>, %arg3: memref<1x128xf32, #tpu.memory_space<vmem>>, %arg4: memref<8x128xf32, #tpu.memory_space<vmem>>) attributes {dimension_semantics = [#tpu.dimension_semantics<parallel>], iteration_bounds = array<i64: 1>, scalar_prefetch = 0 : i64, scratch_operands = 0 : i64, tpu.core_type = #tpu.core_type<tc>, window_params = [{transform_indices = @transform_0, window_bounds = array<i64: 8, 32>}, {pipeline_mode = #tpu.pipeline_mode<synchronous>, transform_indices = @transform_1, window_bounds = array<i64: 32, 128>}, {pipeline_mode = #tpu.pipeline_mode<synchronous>, transform_indices = @transform_2, window_bounds = array<i64: 1, 128>}, {transform_indices = @transform_3, window_bounds = array<i64: 8, 128>}]} {
    %c0 = arith.constant 0 : index
    %c0_0 = arith.constant 0 : index
    %0 = vector.load %arg1[%c0, %c0_0] : memref<8x32xbf16, #tpu.memory_space<vmem>>, vector<8x32xbf16>
    %c0_1 = arith.constant 0 : index
    %c0_2 = arith.constant 0 : index
    %1 = vector.load %arg2[%c0_1, %c0_2] : memref<32x128xbf16, #tpu.memory_space<vmem>>, vector<32x128xbf16>
    %cst = arith.constant dense<0.000000e+00> : vector<8x128xf32>
    %2 = tpu.matmul %0, %1, %cst {dimension_numbers = #tpu.dot_dimension_numbers<[1], [0], [0], [1], [0, 0, 1, 1], [], []>} : vector<8x32xbf16>, vector<32x128xbf16>, vector<8x128xf32> -> vector<8x128xf32>
    %c0_3 = arith.constant 0 : index
    %c0_4 = arith.constant 0 : index
    %3 = vector.load %arg3[%c0_3, %c0_4] : memref<1x128xf32, #tpu.memory_space<vmem>>, vector<1x128xf32>
    %4 = vector.broadcast %3 : vector<1x128xf32> to vector<8x128xf32>
    %5 = arith.addf %2, %4 : vector<8x128xf32>
    %6 = arith.negf %5 : vector<8x128xf32>
    %7 = math.exp %6 : vector<8x128xf32>
    %cst_5 = arith.constant 1.000000e+00 : f32
    %8 = vector.broadcast %cst_5 : f32 to vector<8x128xf32>
    %9 = arith.addf %8, %7 : vector<8x128xf32>
    %10 = arith.divf %8, %9 : vector<8x128xf32>
    %c0_6 = arith.constant 0 : index
    %c0_7 = arith.constant 0 : index
    %11 = vector.load %arg4[%c0_6, %c0_7] : memref<8x128xf32, #tpu.memory_space<vmem>>, vector<8x128xf32>
    tpu.vector_store %arg4[%c0_6, %c0_7], %10 {strides = array<i32>} : memref<8x128xf32, #tpu.memory_space<vmem>>, vector<8x128xf32>,
    return
  }
  func.func @transform_0(%arg0: i32) -> (i32, i32) {
    %c0_i32 = arith.constant 0 : i32
    %c0_i32_0 = arith.constant 0 : i32
    return %arg0, %c0_i32 : i32, i32
  }
  func.func @transform_1(%arg0: i32) -> (i32, i32) {
    %c0_i32 = arith.constant 0 : i32
    %c0_i32_0 = arith.constant 0 : i32
    %c0_i32_1 = arith.constant 0 : i32
    return %c0_i32, %c0_i32_0 : i32, i32
  }
  func.func @transform_2(%arg0: i32) -> (i32, i32) {
    %c0_i32 = arith.constant 0 : i32
    %c0_i32_0 = arith.constant 0 : i32
    %c0_i32_1 = arith.constant 0 : i32
    return %c0_i32, %c0_i32_0 : i32, i32
  }
  func.func @transform_3(%arg0: i32) -> (i32, i32) {
    %c0_i32 = arith.constant 0 : i32
    %c0_i32_0 = arith.constant 0 : i32
    return %arg0, %c0_i32 : i32, i32
  }
}

</mosaic_0001>

<bundles_post_ra>
// kernel: tpu_custom_call.1
= control target key start
LH: loop header
LB: loop body
LE: loop exit
PB: predicated region body
PF: predicated region fallthrough
CT: control target
= control target key end

     0   :  { %8 = vsyncpa [#allocation3], 0  ;;  %s307_s0 = inlined_call_operand.hbm [shape: bf16[8,32], index: 0, kind: input, shape index: {}]   ;;  %s308_s1 = inlined_call_operand.hbm [shape: bf16[32,128], index: 1, kind: input, shape index: {}]   ;;  %s309_s2 = inlined_call_operand.vmem [shape: f32[1,128], index: 2, kind: input, shape index: {}]   ;;  %s310_s3 = inlined_call_operand.hbm [shape: f32[8,128], index: 3, kind: output, shape index: {}]  }
   0x1   :  { %9 = vsyncpa [#allocation6], 0 }
   0x2   :  { %10 = vsyncpa [#allocation4], 0  ;;  %s234_s12 = smov [#allocation2]   ;;  %s235_s14 = smov [#allocation5]  }
   0x3   :  { %s17_s13 = sshll.u32 %s234_s12, 4  ;;  %s26_s15 = sshll.u32 %s235_s14, 4  ;;  %s18_s13 = int_to_ptr.vmem [resolvable:$true] %s17_s13  ;;  %s261_s15 = int_to_ptr.vmem [resolvable:$true] %s26_s15 }
   0x4   :  { %s162_s18 = scalar_lea.hbm %s307_s0, 64 }
   0x5   :  { %p163_p0 = scmp.ne.s32.totalorder %s307_s0, %s162_s18  ;;  %p166_p1 = scmp.lt.u32.totalorder %s162_s18, %s307_s0 }
   0x7   :  { %p168_p2 = pnand %p166_p1, %p163_p0 }
   0x9   :  { %171 = shalt.err (!%p168_p2)
}
   0xa   :  { %s172_s23 = scalar_lea.vmem %s18_s13, 64  ;;  %p177_p4 = scmp.lt.s32.totalorder %s18_s13, %s18_s13 }
   0xb   :  { %p173_p3 = scmp.ne.s32.totalorder %s18_s13, %s172_s23  ;;  %p178_p5 = scmp.lt.s32.totalorder %s172_s23, %s172_s23 }
   0xd   :  { %p179_p6 = por %p178_p5, %p177_p4 }
   0xf   :  { %p180_p7 = pnand %p179_p6, %p173_p3 }
  0x11   :  { %183 = shalt.err (!%p180_p7)
}
  0x12   :  { %20 = dma.hbm_to_vmem [thread:$0]  %s307_s0, 64, %s18_s13, [#allocation3]  }
  0x13   :  { %s184_s28 = scalar_lea.hbm %s308_s1, 256 }
  0x14   :  { %p185_p8 = scmp.ne.s32.totalorder %s308_s1, %s184_s28  ;;  %p188_p9 = scmp.lt.u32.totalorder %s184_s28, %s308_s1 }
  0x16   :  { %p190_p10 = pnand %p188_p9, %p185_p8 }
  0x18   :  { %193 = shalt.err (!%p190_p10)
}
  0x19   :  { %s194_s6 = scalar_lea.vmem %s261_s15, 256  ;;  %p199_p12 = scmp.lt.s32.totalorder %s261_s15, %s261_s15 }
  0x1a   :  { %p195_p11 = scmp.ne.s32.totalorder %s261_s15, %s194_s6  ;;  %p200_p13 = scmp.lt.s32.totalorder %s194_s6, %s194_s6 }
  0x1c   :  { %p201_p0 = por %p200_p13, %p199_p12 }
  0x1e   :  { %p202_p1 = pnand %p201_p0, %p195_p11 }
  0x20   :  { %205 = shalt.err (!%p202_p1)
}
  0x21   :  { %s236_s0 = smov 64   ;;  %s237_s7 = smov 4  }
  0x22   :  { %32 = dma.hbm_to_vmem [thread:$0]  %s308_s1, 256, %s261_s15, [#allocation6], %s236_s0, %s236_s0, %s237_s7  }
  0x23   :  { %228 = dma.done.wait [#allocation3], 64  }
  0x24   :  { %229 = vsyncadd [#allocation3], 4294967232 }
  0x25   :  { %230 = dma.done.wait [#allocation6], 256  }
  0x26   :  { %231 = vsyncadd [#allocation6], 4294967040  ;;  %v238_v0 = vmov 0.0   ;;  %vm239_vm0 = vmmov 0   ;;  %v156_v1 = vld [vmem:[#allocation5] sm:$0xff]   ;;  %v157_v2 = vld [vmem:[#allocation5 + $0x8] sm:$0xff]  }
  0x27   :  { %141 = vmatprep.subr.bf16.mxu0 %v238_v0  ;;  %145 = vmatprep.mubr.msk.bf16.mxu0 %vm239_vm0, %v238_v0  ;;  %v42_v3 = vld [vmem:[#allocation2] sm:$0xf]  ;;  %vm66_vm1 = vcmask 261120   ;;  %s240_s1 = smov [#allocation7]  }
  0x28   :  { %142 = vmatpush3.bf16.msra.mxu0 %v156_v1  ;;  %v133_v4 = vld [vmem:[%s309_s2] ss:$0 sm:$0xff]  ;;  %s123_s12 = sshll.u32 %s240_s1, 4  ;;  %s124_s12 = int_to_ptr.vmem [resolvable:$true] %s123_s12 }
  0x29   :  { %143 = vmatprep.subr.bf16.mxu0 %v238_v0  ;;  %s206_s13 = scalar_lea.vmem %s124_s12, 128  ;;  %p211_p3 = scmp.lt.s32.totalorder %s124_s12, %s124_s12 }
  0x2a   :  { %p207_p2 = scmp.ne.s32.totalorder %s124_s12, %s206_s13  ;;  %p212_p4 = scmp.lt.s32.totalorder %s206_s13, %s206_s13 }
  0x2c   :  { %144 = vmatpush3.bf16.msra.mxu0 %v157_v2  ;;  %p213_p5 = por %p212_p4, %p211_p3 }
  0x2e   :  { %p214_p6 = pnand %p213_p5, %p207_p2 }
  0x2f   :  { %146 = vmatmul.mubr.msk.bf16.vlgmr.msra.gmra.mrb[0].mxu0 %vm66_vm1, %v42_v3 }
 0x102   :  { %v104_v5 = vpop.f32.mrb[0].mxu0 }
 0x103   :  { %v105_v6 = vadd.f32 %v133_v4, %v104_v5  ;;  %v147_v7 = vpop.f32.mrb[1].mxu0 }
 0x104   :  { %v107_v8 = vpop.f32.mrb[2].mxu0 }
 0x105   :  { %v137_v9 = vmul.f32 -1.442695, %v105_v6  ;;  %v148_v10 = vpop.f32.mrb[3].mxu0 }
 0x107   :  { %158 = vpow2.f32 %v137_v9 }
 0x111   :  { %v159_v11 = vpop.eup %158 }
 0x112   :  { %v113_v12 = vadd.f32 1.0, %v159_v11 }
 0x114   :  { %160 = vrcp.f32 %v113_v12 }
 0x11e   :  { %v161_v13 = vpop.eup %160 }
 0x11f   :  { %116 = vst [vmem:[#allocation7] sm:$0xff] %v161_v13 }
 0x120   :  { %217 = shalt.err (!%p214_p6)
}
 0x121   :  { %s218_s15 = scalar_lea.hbm %s310_s3, 128 }
 0x122   :  { %p219_p7 = scmp.ne.s32.totalorder %s310_s3, %s218_s15  ;;  %p222_p8 = scmp.lt.u32.totalorder %s218_s15, %s310_s3 }
 0x124   :  { %p224_p9 = pnand %p222_p8, %p219_p7 }
 0x126   :  { %227 = shalt.err (!%p224_p9)
}
 0x127   :  { %126 = dma.vmem_to_hbm [thread:$0]  %s124_s12, 128, %s310_s3, [#allocation4]  }
 0x128   :  { %232 = dma.done.wait [#allocation4], 128  }
 0x129   :  { %233 = vsyncadd [#allocation4], 4294967168 }
 0x12a   :  { %130 = vsyncpa [#allocation3], 1 }
 0x12b   :  { %131 = vsyncpa [#allocation6], 1 }
 0x12c   :  { %132 = vsyncpa [#allocation4], 1 }

</bundles_post_ra>
